<compile_context>
chip_gen: v6e
topology: v6e:2x2x1
jax: 0.10.0
libtpu: 0.0.40
codegen_flags: <defaults>
</compile_context>

<pallas_src>
import functools

import jax
import jax.numpy as jnp
from jax import lax
from jax.experimental import pallas as pl
from jax.experimental.pallas import tpu as pltpu

LEAKY_SLOPE = 0.1
BN_EPS = 1e-5

CONFIG = [(32, 3, 1), (64, 3, 2), ['R', 1], (128, 3, 2), ['R', 2],
          (256, 3, 2), ['R', 8], (512, 3, 2), ['R', 8], (1024, 3, 2), ['R', 4]]


def _round_up(x, m):
    return ((x + m - 1) // m) * m


def _mosaic_params(semantics, vmem_bytes):
    # Explicit VMEM budget (generous floor, headroom under v7x's 64 MiB VMEM).
    limit = int(min(max(4 * vmem_bytes, 32 * 1024 * 1024), 48 * 1024 * 1024))
    return pltpu.CompilerParams(dimension_semantics=semantics,
                                vmem_limit_bytes=limit)


# ---------------------------------------------------------------------------
# Kernel 1: tiled matmul + BN affine + LeakyReLU  (stem conv via im2col, 1x1s)
# ---------------------------------------------------------------------------
def matmul_bn_leaky_kernel(p_ref, w_ref, s_ref, b_ref, o_ref, acc_ref):
    k = pl.program_id(2)

    @pl.when(k == 0)
    def _():
        acc_ref[...] = jnp.zeros_like(acc_ref)

    acc_ref[...] += jnp.dot(p_ref[...], w_ref[...],
                            preferred_element_type=jnp.float32)

    @pl.when(k == pl.num_programs(2) - 1)
    def _():
        y = acc_ref[...] * s_ref[...] + b_ref[...]
        o_ref[...] = jnp.maximum(y, LEAKY_SLOPE * y).astype(o_ref.dtype)


def fused_matmul(patches, w2d, scale, bias):
    """patches: (M, Kd) bf16, w2d: (Kp, Np) bf16 pre-padded, scale/bias (1, Np)."""
    M, Kd = patches.shape
    Kp, Np = w2d.shape
    if Kd != Kp:                                  # only the 3-channel stem
        patches = jnp.pad(patches, ((0, 0), (0, Kp - Kd)))

    TM = 512 if M >= 1024 else min(256, _round_up(M, 16))
    Mp = _round_up(M, TM)
    if Mp != M:
        patches = jnp.pad(patches, ((0, Mp - M), (0, 0)))

    TN = 256 if Np % 256 == 0 else 128
    TK = next(t for t in (512, 384, 256, 128) if Kp % t == 0)
    grid = (Mp // TM, Np // TN, Kp // TK)

    vmem = (2 * (TM * TK + TK * TN + TM * TN) * 2
            + TM * TN * 4 + 4 * TN * 4 * 2)

    out = pl.pallas_call(
        matmul_bn_leaky_kernel,
        out_shape=jax.ShapeDtypeStruct((Mp, Np), jnp.bfloat16),
        grid_spec=pltpu.PrefetchScalarGridSpec(
            num_scalar_prefetch=0,
            grid=grid,
            in_specs=[
                pl.BlockSpec((TM, TK), lambda i, j, k: (i, k)),
                pl.BlockSpec((TK, TN), lambda i, j, k: (k, j)),
                pl.BlockSpec((1, TN), lambda i, j, k: (0, j)),
                pl.BlockSpec((1, TN), lambda i, j, k: (0, j)),
            ],
            out_specs=pl.BlockSpec((TM, TN), lambda i, j, k: (i, j)),
            scratch_shapes=[pltpu.VMEM((TM, TN), jnp.float32)],
        ),
        compiler_params=_mosaic_params(("parallel", "parallel", "arbitrary"),
                                       vmem),
    )(patches, w2d, scale, bias)
    return out[:M] if Mp != M else out


# ---------------------------------------------------------------------------
# Kernel 2: direct 3x3 stride-1 conv + BN + LeakyReLU (+ fused residual add)
# ---------------------------------------------------------------------------
def _dc3_kernel(x_ref, w_ref, s_ref, b_ref, *rest, H, W, Cin, has_skip):
    """x_ref: (H*W, Cin) bf16 (whole image), w_ref: (3, 3*Cin, TN) bf16,
    s_ref/b_ref: (1, TN) f32, optional skip_ref and o_ref: (H*W, TN) bf16.
    xcat scratch: ((H+2)*W, 3*Cin) bf16 (rows = padded input rows, lanes =
    [left|center|right] taps).  acc scratch: (H*W, TN) f32."""
    if has_skip:
        skip_ref, o_ref, xcat_ref, acc_ref = rest
    else:
        o_ref, xcat_ref, acc_ref = rest
    HW = H * W
    j = pl.program_id(1)

    @pl.when(j == 0)
    def _stage():                                   # once per image, all cout blocks reuse
        x = x_ref[...]                              # (HW, Cin)
        if HW > 1:
            zrow = jnp.zeros((1, Cin), x.dtype)
            left = jnp.concatenate([zrow, x[:HW - 1, :]], axis=0)
            right = jnp.concatenate([x[1:, :], zrow], axis=0)
            col = lax.broadcasted_iota(jnp.int32, (HW, 1), 0) % W
            left = jnp.where(col == 0, jnp.zeros_like(left), left)
            right = jnp.where(col == W - 1, jnp.zeros_like(right), right)
        else:
            left = jnp.zeros_like(x)
            right = jnp.zeros_like(x)
        zhalo = jnp.zeros((W, 3 * Cin), x.dtype)
        xcat_ref[0:W, :] = zhalo                                     # top halo row
        xcat_ref[W:W + HW, :] = jnp.concatenate([left, x, right], axis=-1)
        xcat_ref[W + HW:, :] = zhalo                                 # bottom halo row

    # 3 MXU matmuls, K = 3*Cin, f32 accumulation in VMEM scratch.
    acc_ref[...] = jnp.dot(xcat_ref[0:HW, :], w_ref[0],
                           preferred_element_type=jnp.float32)
    acc_ref[...] += jnp.dot(xcat_ref[W:W + HW, :], w_ref[1],
                            preferred_element_type=jnp.float32)
    acc_ref[...] += jnp.dot(xcat_ref[2 * W:2 * W + HW, :], w_ref[2],
                            preferred_element_type=jnp.float32)

    y = acc_ref[...] * s_ref[...] + b_ref[...]
    y = jnp.maximum(y, LEAKY_SLOPE * y)
    if has_skip:
        y = y + skip_ref[...].astype(jnp.float32)
    o_ref[...] = y.astype(o_ref.dtype)


def direct_conv3x3_s1(x, p, skip=None):
    N, H, W, Cin = x.shape
    cout_p = p['scale'].shape[1]
    HW = H * W
    x3 = x.reshape(N, HW, Cin)                      # free reshape

    TN = 256 if cout_p % 256 == 0 else 128
    grid = (N, cout_p // TN)

    in_specs = [pl.BlockSpec((None, HW, Cin), lambda n, j: (n, 0, 0)),
                pl.BlockSpec((3, 3 * Cin, TN), lambda n, j: (0, 0, j)),
                pl.BlockSpec((1, TN), lambda n, j: (0, j)),
                pl.BlockSpec((1, TN), lambda n, j: (0, j))]
    args = [x3, p['w3'], p['scale'], p['bias']]

    has_skip = skip is not None
    if has_skip:
        in_specs.append(pl.BlockSpec((None, HW, TN), lambda n, j: (n, 0, j)))
        args.append(skip.reshape(N, HW, cout_p))

    vmem = (2 * HW * Cin * 2
            + 2 * 9 * Cin * TN * 2
            + (2 + 2 * int(has_skip)) * HW * TN * 2
            + (H + 2) * W * 3 * Cin * 2
            + HW * TN * 4
            + 4 * TN * 4)

    out = pl.pallas_call(
        functools.partial(_dc3_kernel, H=H, W=W, Cin=Cin, has_skip=has_skip),
        out_shape=jax.ShapeDtypeStruct((N, HW, cout_p), jnp.bfloat16),
        grid_spec=pltpu.PrefetchScalarGridSpec(
            num_scalar_prefetch=0,
            grid=grid,
            in_specs=in_specs,
            out_specs=pl.BlockSpec((None, HW, TN), lambda n, j: (n, 0, j)),
            scratch_shapes=[pltpu.VMEM(((H + 2) * W, 3 * Cin), jnp.bfloat16),
                            pltpu.VMEM((HW, TN), jnp.float32)],
        ),
        compiler_params=_mosaic_params(("parallel", "arbitrary"), vmem),
    )(*args)
    return out.reshape(N, H, W, cout_p)


# ---------------------------------------------------------------------------
# Kernel 3: direct 3x3 stride-2 conv + BN + LeakyReLU (downsample layers)
# ---------------------------------------------------------------------------
def _dc3s2_kernel(x_ref, w_ref, s_ref, b_ref, o_ref, xcat_ref, *, Ho, Wo, Cin):
    """x_ref: (Ho*Wo, 4*Cin) bf16 = 4-phase space-to-depth [p00|p01|p10|p11],
    w_ref: (9*Cin, TN) bf16, o_ref: (Ho*Wo, TN) bf16.
    xcat scratch: (Ho*Wo, 9*Cin) bf16, 9 taps in (di, dj) order."""
    j = pl.program_id(1)
    M = Ho * Wo

    @pl.when(j == 0)
    def _stage():
        xs = x_ref[...]                              # (M, 4*Cin)
        p00 = xs[:, :Cin]
        p01 = xs[:, Cin:2 * Cin]
        p10 = xs[:, 2 * Cin:3 * Cin]
        p11 = xs[:, 3 * Cin:]

        def shift(a, k):                             # a[m-k] with zero fill
            if k <= 0:
                return a
            if k >= M:
                return jnp.zeros_like(a)
            return jnp.concatenate(
                [jnp.zeros((k, Cin), a.dtype), a[:M - k, :]], axis=0)

        if Wo > 1:
            col = lax.broadcasted_iota(jnp.int32, (M, 1), 0) % Wo
            mask_c0 = lambda a: jnp.where(col == 0, jnp.zeros_like(a), a)
        else:
            mask_c0 = lambda a: jnp.zeros_like(a)

        taps = [
            mask_c0(shift(p11, Wo + 1)),   # (di=0, dj=0): x[2r-1, 2c-1]
            shift(p10, Wo),                # (0, 1):      x[2r-1, 2c]
            shift(p11, Wo),                # (0, 2):      x[2r-1, 2c+1]
            mask_c0(shift(p01, 1)),        # (1, 0):      x[2r,   2c-1]
            p00,                           # (1, 1):      x[2r,   2c]
            p01,                           # (1, 2):      x[2r,   2c+1]
            mask_c0(shift(p11, 1)),        # (2, 0):      x[2r+1, 2c-1]
            p10,                           # (2, 1):      x[2r+1, 2c]
            p11,                           # (2, 2):      x[2r+1, 2c+1]
        ]
        xcat_ref[...] = jnp.concatenate(taps, axis=-1)

    y = jnp.dot(xcat_ref[...], w_ref[...], preferred_element_type=jnp.float32)
    y = y * s_ref[...] + b_ref[...]
    y = jnp.maximum(y, LEAKY_SLOPE * y)
    o_ref[...] = y.astype(o_ref.dtype)


def direct_conv3x3_s2(x, p):
    N, H, W, Cin = x.shape
    Ho, Wo = H // 2, W // 2
    M = Ho * Wo
    cout_p = p['scale'].shape[1]

    # 4-phase space-to-depth (single XLA relayout, no 9x im2col inflation).
    # TODO(synk): move the phase split in-kernel to save this HBM round trip.
    xs = x.reshape(N, Ho, 2, Wo, 2, Cin)
    xs = jnp.transpose(xs, (0, 1, 3, 2, 4, 5)).reshape(N, M, 4 * Cin)

    TN = 256 if cout_p % 256 == 0 else 128
    grid = (N, cout_p // TN)

    vmem = (2 * M * 4 * Cin * 2
            + 2 * 9 * Cin * TN * 2
            + 2 * M * TN * 2
            + M * 9 * Cin * 2
            + 4 * TN * 4)

    out = pl.pallas_call(
        functools.partial(_dc3s2_kernel, Ho=Ho, Wo=Wo, Cin=Cin),
        out_shape=jax.ShapeDtypeStruct((N, M, cout_p), jnp.bfloat16),
        grid_spec=pltpu.PrefetchScalarGridSpec(
            num_scalar_prefetch=0,
            grid=grid,
            in_specs=[pl.BlockSpec((None, M, 4 * Cin), lambda n, j: (n, 0, 0)),
                      pl.BlockSpec((9 * Cin, TN), lambda n, j: (0, j)),
                      pl.BlockSpec((1, TN), lambda n, j: (0, j)),
                      pl.BlockSpec((1, TN), lambda n, j: (0, j))],
            out_specs=pl.BlockSpec((None, M, TN), lambda n, j: (n, 0, j)),
            scratch_shapes=[pltpu.VMEM((M, 9 * Cin), jnp.bfloat16)],
        ),
        compiler_params=_mosaic_params(("parallel", "arbitrary"), vmem),
    )(xs, p['w2d'], p['scale'], p['bias'])
    return out.reshape(N, Ho, Wo, cout_p)


# ---------------------------------------------------------------------------
# Layer dispatch
# ---------------------------------------------------------------------------
def im2col(x, ksize, stride):
    """Used only for the 3-channel stem conv."""
    N, H, W, C = x.shape
    pad = ksize // 2
    xp = jnp.pad(x, ((0, 0), (pad, pad), (pad, pad), (0, 0)))
    Ho = (H + 2 * pad - ksize) // stride + 1
    Wo = (W + 2 * pad - ksize) // stride + 1
    cols = []
    for di in range(ksize):
        for dj in range(ksize):
            cols.append(xp[:, di:di + Ho * stride:stride,
                           dj:dj + Wo * stride:stride, :])
    patches = jnp.concatenate(cols, axis=-1)
    return patches.reshape(N * Ho * Wo, ksize * ksize * C), (N, Ho, Wo)


def conv_apply(x, p, skip=None):
    t = p['type']
    if t == 'dc3':
        return direct_conv3x3_s1(x, p, skip)
    assert skip is None
    if t == 'dc3s2':
        return direct_conv3x3_s2(x, p)
    N, H, W, C = x.shape
    if p['k'] == 1:
        patches, (Ho, Wo) = x.reshape(N * H * W, C), (H, W)
    else:
        patches, (N, Ho, Wo) = im2col(x, p['k'], p['stride'])
    y = fused_matmul(patches, p['w2d'], p['scale'], p['bias'])
    return y.reshape(N, Ho, Wo, -1)


# ---------------------------------------------------------------------------
# Parameter init (deterministic synthetic weights, pre-padded + bf16) + forward
# ---------------------------------------------------------------------------
def init_cnn_block(key, cin_real, cin_pad, cout_real, ksize, stride):
    cout_pad = _round_up(cout_real, 128)
    kw, kg, kb, km, kv = jax.random.split(key, 5)
    w = jax.random.normal(kw, (ksize, ksize, cin_real, cout_real), jnp.float32) * 0.05
    gamma = 1.0 + 0.1 * jax.random.normal(kg, (cout_real,), jnp.float32)
    beta = 0.1 * jax.random.normal(kb, (cout_real,), jnp.float32)
    running_mean = 0.1 * jax.random.normal(km, (cout_real,), jnp.float32)
    running_var = 1.0 + 0.1 * jnp.abs(jax.random.normal(kv, (cout_real,), jnp.float32))
    scale_r = gamma / jnp.sqrt(running_var + BN_EPS)    # eval-mode BN folded
    bias_r = beta - running_mean * scale_r

    w_pad = jnp.zeros((ksize, ksize, cin_pad, cout_pad), jnp.float32)
    w_pad = w_pad.at[:, :, :cin_real, :cout_real].set(w).astype(jnp.bfloat16)
    scale = jnp.zeros((1, cout_pad), jnp.float32).at[0, :cout_real].set(scale_r)
    bias = jnp.zeros((1, cout_pad), jnp.float32).at[0, :cout_real].set(bias_r)

    p = {'k': ksize, 'stride': stride, 'cout_real': cout_real,
         'scale': scale, 'bias': bias}
    if ksize == 3 and cin_pad % 128 == 0:
        if stride == 1:
            p['type'] = 'dc3'
            p['w3'] = w_pad.reshape(3, 3 * cin_pad, cout_pad)       # (di, dj*cin, cout)
        else:
            p['type'] = 'dc3s2'
            p['w2d'] = w_pad.reshape(9 * cin_pad, cout_pad)          # (di*dj*cin, cout)
    else:
        p['type'] = 'mm'
        kdim = ksize * ksize * cin_pad
        kdim_p = _round_up(kdim, 128)
        w2d = w_pad.reshape(kdim, cout_pad)
        if kdim_p != kdim:
            w2d = jnp.pad(w2d, ((0, kdim_p - kdim), (0, 0)))
        p['w2d'] = w2d
    return p


def init_darknet53(key):
    layers = []
    in_real, in_pad = 3, 3
    for module in CONFIG:
        if isinstance(module, tuple):
            out_c, ksize, stride = module
            key, sub = jax.random.split(key)
            layers.append(('conv', init_cnn_block(sub, in_real, in_pad,
                                                  out_c, ksize, stride)))
            in_real, in_pad = out_c, _round_up(out_c, 128)
        elif isinstance(module, list) and module[0] == 'R':
            blocks = []
            for _ in range(module[1]):
                key, k1, k2 = jax.random.split(key, 3)
                mid_real = in_real // 2
                mid_pad = _round_up(mid_real, 128)
                b1 = init_cnn_block(k1, in_real, in_pad, mid_real, 1, 1)
                b2 = init_cnn_block(k2, mid_real, mid_pad, in_real, 3, 1)
                blocks.append((b1, b2))
            layers.append(('res', blocks))
    return layers


def darknet53_forward(x, layers):
    """x: (N, H, W, 3) NHWC f32. Returns (final_feature, [route_/8, route_/16])."""
    x = x.astype(jnp.bfloat16)
    intermediate_feature_maps = []
    c_real = x.shape[-1]
    for kind, payload in layers:
        if kind == 'conv':
            x = conv_apply(x, payload)
            c_real = payload['cout_real']
        else:                                        # residual group
            # TODO(synk): batch all blocks of a stage into one pallas_call and
            # fuse the 1x1 -> 3x3 pair for the tiny late-stage spatial sizes.
            for b1, b2 in payload:
                y = conv_apply(x, b1)                # 1x1 (matmul path)
                x = conv_apply(y, b2, skip=x)        # direct 3x3 + fused skip add
            if len(payload) == 8:
                intermediate_feature_maps.append(
                    x[..., :c_real].astype(jnp.float32))
    return x[..., :c_real].astype(jnp.float32), intermediate_feature_maps


if __name__ == "__main__":
    key = jax.random.PRNGKey(0)
    kx, kp = jax.random.split(key)

    # PyTorch-style NCHW input; transposed once to NHWC for the kernel pipeline.
    x_nchw = jax.random.normal(kx, (2, 3, 32, 32), jnp.float32)
    x = jnp.transpose(x_nchw, (0, 2, 3, 1))

    layers = init_darknet53(kp)
    out, feats = darknet53_forward(x, layers)

    jax.block_until_ready(out)
    for f in feats:
        jax.block_until_ready(f)

    assert out.shape == (2, 1, 1, 1024)
    assert feats[0].shape == (2, 4, 4, 256)
    assert feats[1].shape == (2, 2, 2, 512)
    print("KERNEL_OK")
</pallas_src>

<mosaic_0001>
module attributes {stable_mosaic.version = 11 : i64} {
  func.func @matmul_bn_leaky_kernel(%arg0: i32, %arg1: i32, %arg2: i32, %arg3: memref<512x128xbf16, #tpu.memory_space<vmem>>, %arg4: memref<128x128xbf16, #tpu.memory_space<vmem>>, %arg5: memref<1x128xf32, #tpu.memory_space<vmem>>, %arg6: memref<1x128xf32, #tpu.memory_space<vmem>>, %arg7: memref<512x128xbf16, #tpu.memory_space<vmem>>, %arg8: memref<512x128xf32, #tpu.memory_space<vmem>>) attributes {dimension_semantics = [#tpu.dimension_semantics<parallel>, #tpu.dimension_semantics<parallel>, #tpu.dimension_semantics<arbitrary>], iteration_bounds = array<i64: 4, 1, 1>, scalar_prefetch = 0 : i64, scratch_operands = 1 : i64, tpu.core_type = #tpu.core_type<tc>, window_params = [{transform_indices = @transform_0, window_bounds = array<i64: 512, 128>}, {transform_indices = @transform_1, window_bounds = array<i64: 128, 128>}, {transform_indices = @transform_2, window_bounds = array<i64: 1, 128>}, {transform_indices = @transform_3, window_bounds = array<i64: 1, 128>}, {transform_indices = @transform_4, window_bounds = array<i64: 512, 128>}]} {
    %c0_i32 = arith.constant 0 : i32
    %0 = arith.cmpi eq, %arg2, %c0_i32 : i32
    %1 = arith.extui %0 : i1 to i32
    %c0_i32_0 = arith.constant 0 : i32
    %2 = arith.cmpi ne, %1, %c0_i32_0 : i32
    scf.if %2 {
      %cst_10 = arith.constant 0.000000e+00 : f32
      %12 = vector.broadcast %cst_10 : f32 to vector<512x128xf32>
      %c0_11 = arith.constant 0 : index
      %c0_12 = arith.constant 0 : index
      %13 = vector.load %arg8[%c0_11, %c0_12] : memref<512x128xf32, #tpu.memory_space<vmem>>, vector<512x128xf32>
      tpu.vector_store %arg8[%c0_11, %c0_12], %12 {strides = array<i32>} : memref<512x128xf32, #tpu.memory_space<vmem>>, vector<512x128xf32>,
    } else {
    }
    %c0 = arith.constant 0 : index
    %c0_1 = arith.constant 0 : index
    %3 = vector.load %arg8[%c0, %c0_1] : memref<512x128xf32, #tpu.memory_space<vmem>>, vector<512x128xf32>
    %c0_2 = arith.constant 0 : index
    %c0_3 = arith.constant 0 : index
    %4 = vector.load %arg3[%c0_2, %c0_3] : memref<512x128xbf16, #tpu.memory_space<vmem>>, vector<512x128xbf16>
    %c0_4 = arith.constant 0 : index
    %c0_5 = arith.constant 0 : index
    %5 = vector.load %arg4[%c0_4, %c0_5] : memref<128x128xbf16, #tpu.memory_space<vmem>>, vector<128x128xbf16>
    %cst = arith.constant dense<0.000000e+00> : vector<512x128xf32>
    %6 = tpu.matmul %4, %5, %cst {dimension_numbers = #tpu.dot_dimension_numbers<[1], [0], [0], [1], [0, 0, 1, 1], [], []>} : vector<512x128xbf16>, vector<128x128xbf16>, vector<512x128xf32> -> vector<512x128xf32>
    %7 = arith.addf %3, %6 : vector<512x128xf32>
    %c0_6 = arith.constant 0 : index
    %c0_7 = arith.constant 0 : index
    %8 = vector.load %arg8[%c0_6, %c0_7] : memref<512x128xf32, #tpu.memory_space<vmem>>, vector<512x128xf32>
    tpu.vector_store %arg8[%c0_6, %c0_7], %7 {strides = array<i32>} : memref<512x128xf32, #tpu.memory_space<vmem>>, vector<512x128xf32>,
    %c0_i32_8 = arith.constant 0 : i32
    %9 = arith.cmpi eq, %arg2, %c0_i32_8 : i32
    %10 = arith.extui %9 : i1 to i32
    %c0_i32_9 = arith.constant 0 : i32
    %11 = arith.cmpi ne, %10, %c0_i32_9 : i32
    scf.if %11 {
      %c0_10 = arith.constant 0 : index
      %c0_11 = arith.constant 0 : index
      %12 = vector.load %arg8[%c0_10, %c0_11] : memref<512x128xf32, #tpu.memory_space<vmem>>, vector<512x128xf32>
      %c0_12 = arith.constant 0 : index
      %c0_13 = arith.constant 0 : index
      %13 = vector.load %arg5[%c0_12, %c0_13] : memref<1x128xf32, #tpu.memory_space<vmem>>, vector<1x128xf32>
      %14 = vector.broadcast %13 : vector<1x128xf32> to vector<512x128xf32>
      %15 = arith.mulf %12, %14 : vector<512x128xf32>
      %c0_14 = arith.constant 0 : index
      %c0_15 = arith.constant 0 : index
      %16 = vector.load %arg6[%c0_14, %c0_15] : memref<1x128xf32, #tpu.memory_space<vmem>>, vector<1x128xf32>
      %17 = vector.broadcast %16 : vector<1x128xf32> to vector<512x128xf32>
      %18 = arith.addf %15, %17 : vector<512x128xf32>
      %cst_16 = arith.constant 1.000000e-01 : f32
      %19 = vector.broadcast %cst_16 : f32 to vector<512x128xf32>
      %20 = arith.mulf %19, %18 : vector<512x128xf32>
      %21 = arith.maximumf %18, %20 : vector<512x128xf32>
      %22 = arith.truncf %21 : vector<512x128xf32> to vector<512x128xbf16>
      %c0_17 = arith.constant 0 : index
      %c0_18 = arith.constant 0 : index
      %23 = vector.load %arg7[%c0_17, %c0_18] : memref<512x128xbf16, #tpu.memory_space<vmem>>, vector<512x128xbf16>
      tpu.vector_store %arg7[%c0_17, %c0_18], %22 {strides = array<i32>} : memref<512x128xbf16, #tpu.memory_space<vmem>>, vector<512x128xbf16>,
    } else {
    }
    return
  }
  func.func @transform_0(%arg0: i32, %arg1: i32, %arg2: i32) -> (i32, i32) {
    %c0_i32 = arith.constant 0 : i32
    return %arg0, %arg2 : i32, i32
  }
  func.func @transform_1(%arg0: i32, %arg1: i32, %arg2: i32) -> (i32, i32) {
    %c0_i32 = arith.constant 0 : i32
    return %arg2, %arg1 : i32, i32
  }
  func.func @transform_2(%arg0: i32, %arg1: i32, %arg2: i32) -> (i32, i32) {
    %c0_i32 = arith.constant 0 : i32
    %c0_i32_0 = arith.constant 0 : i32
    return %c0_i32, %arg1 : i32, i32
  }
  func.func @transform_3(%arg0: i32, %arg1: i32, %arg2: i32) -> (i32, i32) {
    %c0_i32 = arith.constant 0 : i32
    %c0_i32_0 = arith.constant 0 : i32
    return %c0_i32, %arg1 : i32, i32
  }
  func.func @transform_4(%arg0: i32, %arg1: i32, %arg2: i32) -> (i32, i32) {
    %c0_i32 = arith.constant 0 : i32
    return %arg0, %arg1 : i32, i32
  }
}

</mosaic_0001>

<bundles_post_ra>
// kernel: tpu_custom_call.1
= control target key start
LH: loop header
LB: loop body
LE: loop exit
PB: predicated region body
PF: predicated region fallthrough
CT: control target
= control target key end

     0   :  { %s3220_s0 = inlined_call_operand.hbm [shape: bf16[2048,128], index: 0, kind: input, shape index: {}]   ;;  %s3221_s1 = inlined_call_operand.hbm [shape: bf16[128,128], index: 1, kind: input, shape index: {}]   ;;  %s3222_s2 = inlined_call_operand.vmem [shape: f32[1,128], index: 2, kind: input, shape index: {}]   ;;  %s3223_s3 = inlined_call_operand.vmem [shape: f32[1,128], index: 3, kind: input, shape index: {}]   ;;  %s3224_s4 = inlined_call_operand.hbm [shape: bf16[2048,128], index: 4, kind: output, shape index: {}]  }
   0x1   :  { %3228 = sst [smem:[#allocation12_spill]] %s3221_s1 }
   0x2   :  { %9 = vsyncpa [#allocation4], 0 }
   0x3   :  { %11 = vsyncpa [#allocation4 + $0x1], 0 }
   0x4   :  { %12 = vsyncpa [#allocation7], 0 }
   0x5   :  { %13 = vsyncpa [#allocation5], 0 }
   0x6   :  { %15 = vsyncpa [#allocation5 + $0x1], 0  ;;  %s2772_s15 = smov 0   ;;  %s2774_s16 = smov 0  }
   0x7   :  { %s2776_s17 = smov 0   ;;  %s2778_s18 = smov 0  }
   0x8   :  { %s2780_s19 = smov 0   ;;  %s2782_s20 = smov 0  }
   0x9 LB: > { %s1965_s21 = sadd.s32 4294967295, %s2738_s20   ;;  %s1966_s22 = sadd.s32 4294967294, %s2738_s20   ;;  %s2738_s20 = sphi %s2782_s20, %s21_s20   ;;  %s2734_s19 = sphi %s2780_s19, %s3247_s19   ;;  %s2730_s18 = sphi %s2778_s18, %s3246_s18   ;;  %s2726_s17 = sphi %s2776_s17, %s3245_s17   ;;  %s2722_s16 = sphi %s2774_s16, %s3244_s16   ;;  %s2718_s15 = sphi %s2772_s15, %s3243_s15  }
   0xa   : > { %p62_p0 = scmp.ne.s32.totalorder %s2722_s16, %s2718_s15  ;;  %p2806_p1 = scmp.eq.s32.totalorder %s1965_s21, 0 }
   0xb   : > { %p2810_p2 = scmp.eq.s32.totalorder %s1965_s21, 3  ;;  %p174_p3 = scmp.eq.s32.totalorder %s1966_s22, 3 }
   0xc   : > { %p2816_p4 = por %p2806_p1, %p62_p0  ;;  %p1967_p5 = scmp.ge.s32.totalorder %s2738_s20, 1 }
   0xd   : > { %p2821_p6 = por %p174_p3, %p62_p0  ;;  %p181_p7 = scmp.lt.s32.totalorder %s2738_s20, 5 }
   0xe   : > { %s2740_s28 = smov [#allocation6]   ;;  %s40_s5 = sadd.s32 1, %s2734_s19 }
   0xf   : > { %s3232_s26 = scalar_select %p2821_p6, 1, 0 }
  0x10   : > { %p2826_p8 = pnand %p1967_p5, %p181_p7  ;;  %s197_s29 = sshll.u32 %s2740_s28, 4  ;;  %s198_s29 = int_to_ptr.vmem [resolvable:$true] %s197_s29 }
  0x11   : > { %s2611_s6 = scalar_lea.vmem %s198_s29, 1024  ;;  %p2619_p3 = scmp.lt.s32.totalorder %s198_s29, %s198_s29 }
  0x12   : > { %p2491_p9 = pneg %p2826_p8  ;;  %p2612_p12 = scmp.ne.s32.totalorder %s198_s29, %s2611_s6 }
  0x13   : > { %p2620_p5 = scmp.lt.s32.totalorder %s2611_s6, %s2611_s6 }
  0x14   : > { %p2834_p10 = pnand %p2491_p9, %p2806_p1 }
  0x15   : > { %p2621_p7 = por %p2620_p5, %p2619_p3 }
  0x16   : > { %p2602_p11 = pneg %p2834_p10 }
  0x18   : > { %p2614_p13 = pnand %p2612_p12, %p2602_p11 }
  0x1a   : > { %p2615_p0 = pneg %p2614_p13 }
  0x1c   : > { %p2622_p6 = pnand %p2621_p7, %p2615_p0 }
  0x1e   : > { %2625 = shalt.err (!%p2622_p6)
}
  0x1f   : > { %s3225_s7 = smov 64   ;;  %s3226_s8 = smov 4  }
  0x20   : > { %s3235_s1 = sld [smem:[#allocation12_spill]]  ;;  %p42_p6 = scmp.ge.s32.totalorder %s40_s5, 4 }
  0x21   : > { %s49_s11 = sadd.s32 1, %s2726_s17  ;;  %p56_p9 = scmp.ne.s32.totalorder %s2726_s17, %s2722_s16 }
  0x22   : > { %p57_p11 = scmp.eq.s32.totalorder %s2738_s20, 0  ;;  %s3249_s5 = smov (%p42_p6, %s40_s5), 0 }
  0x23   : > { %p2861_p13 = por %p2810_p2, %p56_p9  ;;  %s44_s14 = ssub.s32 %s2734_s19, %s3249_s5 }
  0x24   : > { %p2855_p12 = por %p57_p11, %p56_p9  ;;  %p2504_p0 = scmp.lt.s32.totalorder %s2738_s20, 4 }
  0x25   : > { %s3237_s13 = scalar_select %p2861_p13, 1, 0 }
  0x26   : > { %2494 = dma.hbm_to_vmem [thread:$0]  (!%p2834_p10), %s3235_s1, 1024, %s198_s29, [#allocation7], %s3225_s7, %s3225_s7, %s3226_s8  }
  0x27   : > { %p47_p10 = scmp.eq.s32.totalorder %s44_s14, 0  ;;  %s223_s21 = sand.u32 1, %s2726_s17  }
  0x28   : > { %s1972_s22 = sshll.u32 %s223_s21, 8  ;;  %s2090_s29 = sshll.u32 %s2734_s19, 12 }
  0x29   : > { %s2870_s28 = scalar_select %p47_p10, %s2726_s17, %s49_s11  }
  0x2a   : > { %s234_s9 = scalar_lea.hbm %s3220_s0, %s2090_s29  ;;  %s227_s10 = scalar_lea.vmem [#allocation3], %s1972_s22 }
  0x2b   : > { %s235_s7 = sshll.u32 %s227_s10, 4  ;;  %p2878_p2 = pnand %p2504_p0, %p2855_p12  ;;  %s236_s7 = int_to_ptr.vmem [resolvable:$true] %s235_s7 }
  0x2c   : > { %s224_s8 = scalar_lea.sflag [#allocation4], %s223_s21  ;;  %s2639_s14 = scalar_lea.vmem %s236_s7, 4096 }
  0x2d   : > { %p2628_p3 = pneg %p2878_p2  ;;  %p2640_p5 = scmp.ne.s32.totalorder %s236_s7, %s2639_s14 }
  0x2e   : > { %s2743_s11 = smov [#allocation3]  }
  0x2f   : > { %p2642_p7 = pnand %p2640_p5, %p2628_p3  ;;  %s2644_s1 = sshll.u32 %s2743_s11, 4  ;;  %s2645_s1 = int_to_ptr.vmem [resolvable:$false] %s2644_s1 }
  0x30   : > { %s2646_s29 = scalar_lea.vmem %s2645_s1, 8192  ;;  %p2647_p9 = scmp.lt.s32.totalorder %s236_s7, %s2645_s1 }
  0x31   : > { %p2643_p6 = pneg %p2642_p7  ;;  %p2648_p11 = scmp.lt.s32.totalorder %s2646_s29, %s2639_s14 }
  0x33   : > { %p2649_p10 = por %p2648_p11, %p2647_p9 }
  0x35   : > { %p2650_p13 = pnand %p2649_p10, %p2643_p6 }
  0x37   : > { %2653 = shalt.err (!%p2650_p13)
}
  0x38   : > { %s3239_s12 = smov 4   ;;  %s3240_s22 = smov 64  }
  0x39   : > { %2498 = dma.hbm_to_vmem [thread:$0]  (!%p2878_p2), %s234_s9, 4096, %s236_s7, %s224_s8, %s3240_s22, %s3240_s22, %s3239_s12  }
  0x3a   : > { %247 = sbr.rel (%p2826_p8) target bundleno = 386 (0x182), region = 36  ;;  %s2892_s21 = sand.u32 (!%p2826_p8), 1, %s2722_s16  }
  0x3b   : > { %s1976_s1 = sshll.u32 (!%p2826_p8), %s2892_s21, 8  ;;  %s250_s30 = scalar_lea.sflag (!%p2826_p8), [#allocation4], %s2892_s21 }
  0x3c   : > { %s2898_s6 = scalar_lea.vmem (!%p2826_p8), [#allocation3], %s1976_s1 }
  0x3f   : > { %2705 = dma.done.wait (%p2816_p4), %s250_s30, 4096  }
  0x40   : > { %2707 = vsyncadd (%p2816_p4), %s250_s30, 4294963200 }
  0x41   : > { %2709 = dma.done.wait (%p2806_p1), [#allocation7], 1024  }
  0x42   : > { %2711 = vsyncadd (%p2806_p1), [#allocation7], 4294966272  ;;  %v2560_v0 = vld [vmem:[#allocation6 + $0x38] sm:$0xff]   ;;  %v2561_v1 = vld [vmem:[#allocation6 + $0x30] sm:$0xff]   ;;  %s2984_s8 = scalar_lea.vmem [#allocation8], %s1976_s1  ;;  %s2155_s9 = sshll.u32 %s2730_s18, 12 }
  0x43   : > { %2387 = vmatprep.subr.bf16.mxu0 %v2560_v0  ;;  %2467 = vmatprep.subr.bf16.mxu1 %v2560_v0  ;;  %v2562_v2 = vld [vmem:[#allocation6 + $0x28] sm:$0xff]   ;;  %v2563_v3 = vld [vmem:[#allocation6 + $0x20] sm:$0xff]   ;;  %v2564_v6 = vld [vmem:[#allocation6 + $0x18] sm:$0xff]   ;;  %s1839_s10 = sshll.u32 %s2984_s8, 4  ;;  %s3168_s11 = scalar_lea.hbm %s3224_s4, %s2155_s9  ;;  %s3170_s10 = int_to_ptr.vmem [resolvable:$true] %s1839_s10 }
  0x44   : > { %2388 = vmatpush3.bf16.msra.mxu0 %v2560_v0  ;;  %2475 = vmatpush3.bf16.msra.mxu1 %v2560_v0  ;;  %v2568_v4 = vld [vmem:[%s2898_s6] sm:$0xff]   ;;  %v2565_v7 = vld [vmem:[#allocation6 + $0x10] sm:$0xff]   ;;  %v2566_v8 = vld [vmem:[#allocation6 + $0x8] sm:$0xff]   ;;  %s1825_s18 = scalar_lea.sflag [#allocation5], %s2892_s21  ;;  %s2654_s29 = scalar_lea.vmem %s3170_s10, 4096 }
  0x45   : > { %2389 = vmatprep.subr.bf16.mxu0 %v2561_v1  ;;  %2468 = vmatprep.subr.bf16.mxu1 %v2561_v1  ;;  %v2569_v5 = vld [vmem:[%s2898_s6 + $0x80] sm:$0xff]   ;;  %v2570_v10 = vld [vmem:[%s2898_s6 + $0x8] sm:$0xff]   ;;  %v2572_v12 = vld [vmem:[%s2898_s6 + $0x10] sm:$0xff]   ;;  %p2655_p1 = scmp.ne.s32.totalorder %s3170_s10, %s2654_s29  ;;  %p3241_p4 = scmp.ne.s32.totalorder %s3237_s13, 0 }
  0x46   : > { %2403 = vmatprep.mubr.bf16.mxu0 %v2568_v4  ;;  %2435 = vmatprep.mubr.bf16.mxu1 %v2569_v5  ;;  %v2567_v9 = vld [vmem:[#allocation6] sm:$0xff]   ;;  %v2571_v11 = vld [vmem:[%s2898_s6 + $0x88] sm:$0xff]   ;;  %v2573_v13 = vld [vmem:[%s2898_s6 + $0x90] sm:$0xff]   ;;  %s2744_s12 = smov [#allocation8]  }
  0x47   : > { %v2574_v14 = vld [vmem:[%s2898_s6 + $0x18] sm:$0xff]   ;;  %v2576_v16 = vld [vmem:[%s2898_s6 + $0x20] sm:$0xff]   ;;  %v2578_v18 = vld [vmem:[%s2898_s6 + $0x28] sm:$0xff]   ;;  %p2656_p8 = pnand %p2655_p1, %p3241_p4  ;;  %s2658_s22 = sshll.u32 %s2744_s12, 4  ;;  %s2659_s22 = int_to_ptr.vmem [resolvable:$false] %s2658_s22 }
  0x48   : > { %2390 = vmatpush3.bf16.msra.mxu0 %v2561_v1  ;;  %2476 = vmatpush3.bf16.msra.mxu1 %v2561_v1  ;;  %v2575_v15 = vld [vmem:[%s2898_s6 + $0x98] sm:$0xff]   ;;  %v2577_v17 = vld [vmem:[%s2898_s6 + $0xa0] sm:$0xff]   ;;  %v2579_v19 = vld [vmem:[%s2898_s6 + $0xa8] sm:$0xff]   ;;  %s2660_s1 = scalar_lea.vmem %s2659_s22, 8192  ;;  %p2661_p13 = scmp.lt.s32.totalorder %s3170_s10, %s2659_s22 }
  0x49   : > { %2391 = vmatprep.subr.bf16.mxu0 %v2562_v2  ;;  %2469 = vmatprep.subr.bf16.mxu1 %v2562_v2  ;;  %v2580_v20 = vld [vmem:[%s2898_s6 + $0x30] sm:$0xff]   ;;  %v2582_v22 = vld [vmem:[%s2898_s6 + $0x38] sm:$0xff]   ;;  %v2584_v24 = vld [vmem:[%s2898_s6 + $0x40] sm:$0xff]   ;;  %p2657_p12 = pneg %p2656_p8  ;;  %p2662_p0 = scmp.lt.s32.totalorder %s2660_s1, %s2654_s29 }
  0x4a   : > { %v2581_v21 = vld [vmem:[%s2898_s6 + $0xb0] sm:$0xff]   ;;  %v2583_v23 = vld [vmem:[%s2898_s6 + $0xb8] sm:$0xff]   ;;  %v2585_v25 = vld [vmem:[%s2898_s6 + $0xc0] sm:$0xff]  }
  0x4b   : > { %v2586_v26 = vld [vmem:[%s2898_s6 + $0x48] sm:$0xff]   ;;  %v2588_v28 = vld [vmem:[%s2898_s6 + $0x50] sm:$0xff]   ;;  %v2590_v30 = vld [vmem:[%s2898_s6 + $0x58] sm:$0xff]   ;;  %p2663_p2 = por %p2662_p0, %p2661_p13 }
  0x4c   : > { %2392 = vmatpush3.bf16.msra.mxu0 %v2562_v2  ;;  %2477 = vmatpush3.bf16.msra.mxu1 %v2562_v2  ;;  %v2587_v27 = vld [vmem:[%s2898_s6 + $0xc8] sm:$0xff]   ;;  %v2589_v29 = vld [vmem:[%s2898_s6 + $0xd0] sm:$0xff]   ;;  %v2591_v31 = vld [vmem:[%s2898_s6 + $0xd8] sm:$0xff]  }
  0x4d   : > { %2393 = vmatprep.subr.bf16.mxu0 %v2563_v3  ;;  %2470 = vmatprep.subr.bf16.mxu1 %v2563_v3  ;;  %v2592_v32 = vld [vmem:[%s2898_s6 + $0x60] sm:$0xff]   ;;  %v2594_v34 = vld [vmem:[%s2898_s6 + $0x68] sm:$0xff]   ;;  %v2596_v36 = vld [vmem:[%s2898_s6 + $0x70] sm:$0xff]   ;;  %p2664_p3 = pnand %p2663_p2, %p2657_p12 }
  0x4e   : > { %v2593_v33 = vld [vmem:[%s2898_s6 + $0xe0] sm:$0xff]   ;;  %v2595_v35 = vld [vmem:[%s2898_s6 + $0xe8] sm:$0xff]   ;;  %v2597_v37 = vld [vmem:[%s2898_s6 + $0xf0] sm:$0xff]  }
  0x4f   : > { %v2598_v38 = vld [vmem:[%s2898_s6 + $0x78] sm:$0xff]   ;;  %v2943_v40 = vld [vmem:[%s3222_s2] ss:$0 sm:$0xff] }
  0x50   : > { %2394 = vmatpush3.bf16.msra.mxu0 %v2563_v3  ;;  %2478 = vmatpush3.bf16.msra.mxu1 %v2563_v3  ;;  %v2599_v39 = vld [vmem:[%s2898_s6 + $0xf8] sm:$0xff]   ;;  %v2948_v42 = vld [vmem:[%s3223_s3] ss:$0 sm:$0xff] }
  0x51   : > { %2395 = vmatprep.subr.bf16.mxu0 %v2564_v6  ;;  %2471 = vmatprep.subr.bf16.mxu1 %v2564_v6 }
  0x54   : > { %2396 = vmatpush3.bf16.msra.mxu0 %v2564_v6  ;;  %2479 = vmatpush3.bf16.msra.mxu1 %v2564_v6 }
  0x55   : > { %2397 = vmatprep.subr.bf16.mxu0 %v2565_v7  ;;  %2472 = vmatprep.subr.bf16.mxu1 %v2565_v7 }
  0x58   : > { %2398 = vmatpush3.bf16.msra.mxu0 %v2565_v7  ;;  %2480 = vmatpush3.bf16.msra.mxu1 %v2565_v7 }
  0x59   : > { %2399 = vmatprep.subr.bf16.mxu0 %v2566_v8  ;;  %2473 = vmatprep.subr.bf16.mxu1 %v2566_v8 }
  0x5c   : > { %2400 = vmatpush3.bf16.msra.mxu0 %v2566_v8  ;;  %2481 = vmatpush3.bf16.msra.mxu1 %v2566_v8 }
  0x5d   : > { %2401 = vmatprep.subr.bf16.mxu0 %v2567_v9  ;;  %2474 = vmatprep.subr.bf16.mxu1 %v2567_v9 }
  0x60   : > { %2402 = vmatpush3.bf16.msra.mxu0 %v2567_v9  ;;  %2482 = vmatpush3.bf16.msra.mxu1 %v2567_v9 }
  0x63   : > { %2404 = vmatmul.mubr.bf16.vlgmr.msra.gmra.mxu0 %v2570_v10  ;;  %2436 = vmatmul.mubr.bf16.vlgmr.msra.gmra.mxu1 %v2571_v11 }
  0x64   : > { %2407 = vmatprep.mubr.bf16.mxu0 %v2572_v12  ;;  %2439 = vmatprep.mubr.bf16.mxu1 %v2573_v13 }
  0x6b   : > { %2408 = vmatmul.mubr.bf16.gmra.mxu0 %v2574_v14  ;;  %2440 = vmatmul.mubr.bf16.gmra.mxu1 %v2575_v15 }
  0x6c   : > { %2411 = vmatprep.mubr.bf16.mxu0 %v2576_v16  ;;  %2443 = vmatprep.mubr.bf16.mxu1 %v2577_v17 }
  0x73   : > { %2412 = vmatmul.mubr.bf16.gmra.mxu0 %v2578_v18  ;;  %2444 = vmatmul.mubr.bf16.gmra.mxu1 %v2579_v19 }
  0x74   : > { %2415 = vmatprep.mubr.bf16.mxu0 %v2580_v20  ;;  %2447 = vmatprep.mubr.bf16.mxu1 %v2581_v21 }
  0x7b   : > { %2416 = vmatmul.mubr.bf16.gmra.mxu0 %v2582_v22  ;;  %2448 = vmatmul.mubr.bf16.gmra.mxu1 %v2583_v23 }
  0x7c   : > { %2419 = vmatprep.mubr.bf16.mxu0 %v2584_v24  ;;  %2451 = vmatprep.mubr.bf16.mxu1 %v2585_v25 }
  0x83   : > { %2420 = vmatmul.mubr.bf16.gmra.mxu0 %v2586_v26  ;;  %2452 = vmatmul.mubr.bf16.gmra.mxu1 %v2587_v27 }
  0x84   : > { %2423 = vmatprep.mubr.bf16.mxu0 %v2588_v28  ;;  %2455 = vmatprep.mubr.bf16.mxu1 %v2589_v29 }
  0x8b   : > { %2424 = vmatmul.mubr.bf16.gmra.mxu0 %v2590_v30  ;;  %2456 = vmatmul.mubr.bf16.gmra.mxu1 %v2591_v31 }
  0x8c   : > { %2427 = vmatprep.mubr.bf16.mxu0 %v2592_v32  ;;  %2459 = vmatprep.mubr.bf16.mxu1 %v2593_v33 }
  0x93   : > { %2428 = vmatmul.mubr.bf16.gmra.mxu0 %v2594_v34  ;;  %2460 = vmatmul.mubr.bf16.gmra.mxu1 %v2595_v35 }
  0x94   : > { %2431 = vmatprep.mubr.bf16.mxu0 %v2596_v36  ;;  %2463 = vmatprep.mubr.bf16.mxu1 %v2597_v37 }
  0x9b   : > { %2432 = vmatmul.mubr.bf16.gmra.mxu0 %v2598_v38  ;;  %2464 = vmatmul.mubr.bf16.gmra.mxu1 %v2599_v39 }
 0x123   : > { %v2405_v41 = vpop.f32.mrf.mxu0  ;;  %v2437_v43 = vpop.f32.mrf.mxu1 }
 0x124   : > { %v1243_v44 = vmul.f32 %v2405_v41, %v2943_v40  ;;  %v1275_v45 = vmul.f32 %v2437_v43, %v2943_v40 }
 0x125   : > { %v784_v46 = vpop.f32.mrf.mxu0  ;;  %v912_v47 = vpop.f32.mrf.mxu1 }
 0x126   : > { %v1314_v48 = vadd.f32 %v2948_v42, %v1243_v44  ;;  %v1346_v49 = vadd.f32 %v2948_v42, %v1275_v45  ;;  %v1241_v50 = vmul.f32 %v2943_v40, %v784_v46  ;;  %v1273_v51 = vmul.f32 %v2943_v40, %v912_v47 }
 0x127   : > { %v2406_v52 = vpop.f32.mrf.mxu0  ;;  %v2438_v53 = vpop.f32.mrf.mxu1 }
 0x128   : > { %v1378_v54 = vmul.f32 0.1, %v1314_v48  ;;  %v1410_v55 = vmul.f32 0.1, %v1346_v49  ;;  %v1312_v56 = vadd.f32 %v2948_v42, %v1241_v50  ;;  %v1344_v57 = vadd.f32 %v2948_v42, %v1273_v51 }
 0x129   : > { %v1244_v58 = vmul.f32 %v2406_v52, %v2943_v40  ;;  %v1276_v59 = vmul.f32 %v2438_v53, %v2943_v40  ;;  %v787_v60 = vpop.f32.mrf.mxu0  ;;  %v915_v61 = vpop.f32.mrf.mxu1 }
 0x12a   : > { %v1442_v62 = vmax.f32 %v1314_v48, %v1378_v54  ;;  %v1474_v63 = vmax.f32 %v1346_v49, %v1410_v55  ;;  %v1376_v0 = vmul.f32 0.1, %v1312_v56  ;;  %v1408_v1 = vmul.f32 0.1, %v1344_v57 }
 0x12b   : > { %v1315_v2 = vadd.f32 %v2948_v42, %v1244_v58  ;;  %v1347_v3 = vadd.f32 %v2948_v42, %v1276_v59  ;;  %v1242_v4 = vmul.f32 %v2943_v40, %v787_v60  ;;  %v1274_v5 = vmul.f32 %v2943_v40, %v915_v61  ;;  %v2409_v6 = vpop.f32.mrf.mxu0  ;;  %v2441_v7 = vpop.f32.mrf.mxu1 }
 0x12c   : > { %v1440_v8 = vmax.f32 %v1312_v56, %v1376_v0  ;;  %v1472_v9 = vmax.f32 %v1344_v57, %v1408_v1  ;;  %v1247_v10 = vmul.f32 %v2409_v6, %v2943_v40  ;;  %v1279_v11 = vmul.f32 %v2441_v7, %v2943_v40 }
 0x12d   : > { %v1379_v12 = vmul.f32 0.1, %v1315_v2  ;;  %v1411_v13 = vmul.f32 0.1, %v1347_v3  ;;  %v1313_v14 = vadd.f32 %v2948_v42, %v1242_v4  ;;  %v1345_v15 = vadd.f32 %v2948_v42, %v1274_v5  ;;  %v800_v16 = vpop.f32.mrf.mxu0  ;;  %v928_v17 = vpop.f32.mrf.mxu1 }
 0x12e   : > { %v2969_v18 = vadd.f32 %v2948_v42, %v1247_v10  ;;  %v2972_v19 = vadd.f32 %v2948_v42, %v1279_v11  ;;  %v1245_v20 = vmul.f32 %v2943_v40, %v800_v16  ;;  %v1277_v21 = vmul.f32 %v2943_v40, %v928_v17 }
 0x12f   : > { %v1443_v22 = vmax.f32 %v1315_v2, %v1379_v12  ;;  %v1475_v23 = vmax.f32 %v1347_v3, %v1411_v13  ;;  %v1377_v24 = vmul.f32 0.1, %v1313_v14  ;;  %v1409_v25 = vmul.f32 0.1, %v1345_v15  ;;  %v2410_v26 = vpop.f32.mrf.mxu0  ;;  %v2442_v27 = vpop.f32.mrf.mxu1 }
 0x130   : > { %v1382_v28 = vmul.f32 0.1, %v2969_v18  ;;  %v1414_v29 = vmul.f32 0.1, %v2972_v19  ;;  %v1316_v30 = vadd.f32 %v2948_v42, %v1245_v20  ;;  %v1348_v31 = vadd.f32 %v2948_v42, %v1277_v21 }
 0x131   : > { %v2164_v32 = vpack.c.bf16 %v1443_v22, %v1442_v62  ;;  %v2244_v33 = vpack.c.bf16 %v1475_v23, %v1474_v63  ;;  %v1441_v34 = vmax.f32 %v1313_v14, %v1377_v24  ;;  %v1473_v35 = vmax.f32 %v1345_v15, %v1409_v25  ;;  %v803_v36 = vpop.f32.mrf.mxu0  ;;  %v931_v37 = vpop.f32.mrf.mxu1 }
 0x132   : > { %v1446_v38 = vmax.f32 %v2969_v18, %v1382_v28  ;;  %v1478_v39 = vmax.f32 %v2972_v19, %v1414_v29  ;;  %v1248_v44 = vmul.f32 %v2410_v26, %v2943_v40  ;;  %v1280_v45 = vmul.f32 %v2442_v27, %v2943_v40 }
 0x133   : > { %2316 = vst [vmem:[%s2984_s8 + $0x8] sm:$0xff] %v2164_v32   ;;  %2332 = vst [vmem:[%s2984_s8 + $0x88] sm:$0xff] %v2244_v33   ;;  %v2159_v41 = vpack.c.bf16 %v1441_v34, %v1440_v8  ;;  %v2239_v43 = vpack.c.bf16 %v1473_v35, %v1472_v9  ;;  %v2413_v46 = vpop.f32.mrf.mxu0  ;;  %v2445_v47 = vpop.f32.mrf.mxu1  ;;  %v1380_v48 = vmul.f32 0.1, %v1316_v30  ;;  %v1412_v49 = vmul.f32 0.1, %v1348_v31 }
 0x134   : > { %v1246_v50 = vmul.f32 %v2943_v40, %v803_v36  ;;  %v1278_v51 = vmul.f32 %v2943_v40, %v931_v37  ;;  %v1319_v52 = vadd.f32 %v2948_v42, %v1248_v44  ;;  %v1351_v53 = vadd.f32 %v2948_v42, %v1280_v45 }
 0x135   : > { %2160 = vst [vmem:[%s2984_s8] sm:$0xff] %v2159_v41   ;;  %2331 = vst [vmem:[%s2984_s8 + $0x80] sm:$0xff] %v2239_v43   ;;  %v1251_v54 = vmul.f32 %v2413_v46, %v2943_v40  ;;  %v1283_v55 = vmul.f32 %v2445_v47, %v2943_v40  ;;  %v816_v56 = vpop.f32.mrf.mxu0  ;;  %v944_v57 = vpop.f32.mrf.mxu1  ;;  %v1444_v8 = vmax.f32 %v1316_v30, %v1380_v48 }
 0x136   : > { %v1317_v58 = vadd.f32 %v2948_v42, %v1246_v50  ;;  %v1349_v59 = vadd.f32 %v2948_v42, %v1278_v51  ;;  %v1249_v60 = vmul.f32 %v2943_v40, %v816_v56  ;;  %v1281_v61 = vmul.f32 %v2943_v40, %v944_v57 }
 0x137   : > { %v1383_v62 = vmul.f32 0.1, %v1319_v52  ;;  %v1415_v63 = vmul.f32 0.1, %v1351_v53  ;;  %v3003_v0 = vadd.f32 %v2948_v42, %v1251_v54  ;;  %v3006_v1 = vadd.f32 %v2948_v42, %v1283_v55  ;;  %v2414_v2 = vpop.f32.mrf.mxu0  ;;  %v2446_v3 = vpop.f32.mrf.mxu1 }
 0x138   : > { %v1381_v4 = vmul.f32 0.1, %v1317_v58  ;;  %v1413_v5 = vmul.f32 0.1, %v1349_v59  ;;  %v3009_v6 = vadd.f32 %v2948_v42, %v1249_v60  ;;  %v3012_v7 = vadd.f32 %v2948_v42, %v1281_v61 }
 0x139   : > { %v1447_v9 = vmax.f32 %v1319_v52, %v1383_v62  ;;  %v1479_v10 = vmax.f32 %v1351_v53, %v1415_v63  ;;  %v1386_v11 = vmul.f32 0.1, %v3003_v0  ;;  %v819_v12 = vpop.f32.mrf.mxu0  ;;  %v947_v13 = vpop.f32.mrf.mxu1  ;;  %v1476_v14 = vmax.f32 %v1348_v31, %v1412_v49 }
 0x13a   : > { %v1445_v15 = vmax.f32 %v1317_v58, %v1381_v4  ;;  %v1477_v16 = vmax.f32 %v1349_v59, %v1413_v5  ;;  %v1418_v17 = vmul.f32 0.1, %v3006_v1  ;;  %v1384_v20 = vmul.f32 0.1, %v3009_v6 }
 0x13b   : > { %v2174_v18 = vpack.c.bf16 %v1447_v9, %v1446_v38  ;;  %v2254_v19 = vpack.c.bf16 %v1479_v10, %v1478_v39  ;;  %v2417_v21 = vpop.f32.mrf.mxu0  ;;  %v2449_v22 = vpop.f32.mrf.mxu1  ;;  %v1450_v25 = vmax.f32 %v3003_v0, %v1386_v11  ;;  %v1416_v26 = vmul.f32 0.1, %v3012_v7 }
 0x13c   : > { %v2169_v23 = vpack.c.bf16 %v1445_v15, %v1444_v8  ;;  %v2249_v24 = vpack.c.bf16 %v1477_v16, %v1476_v14  ;;  %v1252_v27 = vmul.f32 %v2414_v2, %v2943_v40  ;;  %v1284_v28 = vmul.f32 %v2446_v3, %v2943_v40 }
 0x13d   : > { %2318 = vst [vmem:[%s2984_s8 + $0x18] sm:$0xff] %v2174_v18   ;;  %2334 = vst [vmem:[%s2984_s8 + $0x98] sm:$0xff] %v2254_v19   ;;  %v1250_v29 = vmul.f32 %v2943_v40, %v819_v12  ;;  %v1282_v30 = vmul.f32 %v2943_v40, %v947_v13  ;;  %v832_v31 = vpop.f32.mrf.mxu0  ;;  %v960_v32 = vpop.f32.mrf.mxu1  ;;  %v1482_v33 = vmax.f32 %v3006_v1, %v1418_v17 }
 0x13e   : > { %2317 = vst [vmem:[%s2984_s8 + $0x10] sm:$0xff] %v2169_v23   ;;  %2333 = vst [vmem:[%s2984_s8 + $0x90] sm:$0xff] %v2249_v24   ;;  %v1255_v34 = vmul.f32 %v2417_v21, %v2943_v40  ;;  %v1287_v35 = vmul.f32 %v2449_v22, %v2943_v40  ;;  %v1253_v36 = vmul.f32 %v2943_v40, %v832_v31 }
 0x13f   : > { %v1323_v37 = vadd.f32 %v2948_v42, %v1252_v27  ;;  %v1355_v38 = vadd.f32 %v2948_v42, %v1284_v28  ;;  %v1321_v39 = vadd.f32 %v2948_v42, %v1250_v29  ;;  %v1353_v41 = vadd.f32 %v2948_v42, %v1282_v30  ;;  %v2418_v43 = vpop.f32.mrf.mxu0  ;;  %v2450_v44 = vpop.f32.mrf.mxu1 }
 0x140   : > { %v3036_v45 = vadd.f32 %v2948_v42, %v1255_v34  ;;  %v3039_v46 = vadd.f32 %v2948_v42, %v1287_v35  ;;  %v3042_v47 = vadd.f32 %v2948_v42, %v1253_v36  ;;  %v1285_v48 = vmul.f32 %v2943_v40, %v960_v32 }
 0x141   : > { %v1387_v49 = vmul.f32 0.1, %v1323_v37  ;;  %v1419_v50 = vmul.f32 0.1, %v1355_v38  ;;  %v1385_v51 = vmul.f32 0.1, %v1321_v39  ;;  %v1256_v52 = vmul.f32 %v2418_v43, %v2943_v40  ;;  %v835_v53 = vpop.f32.mrf.mxu0  ;;  %v963_v54 = vpop.f32.mrf.mxu1 }
 0x142   : > { %v1417_v55 = vmul.f32 0.1, %v1353_v41  ;;  %v1390_v56 = vmul.f32 0.1, %v3036_v45  ;;  %v1422_v57 = vmul.f32 0.1, %v3039_v46  ;;  %v1288_v58 = vmul.f32 %v2450_v44, %v2943_v40 }
 0x143   : > { %v1448_v59 = vmax.f32 %v3009_v6, %v1384_v20  ;;  %v1451_v60 = vmax.f32 %v1323_v37, %v1387_v49  ;;  %v1483_v61 = vmax.f32 %v1355_v38, %v1419_v50  ;;  %v1449_v62 = vmax.f32 %v1321_v39, %v1385_v51  ;;  %v2421_v63 = vpop.f32.mrf.mxu0  ;;  %v2453_v0 = vpop.f32.mrf.mxu1 }
 0x144   : > { %v1480_v1 = vmax.f32 %v3012_v7, %v1416_v26  ;;  %v1481_v2 = vmax.f32 %v1353_v41, %v1417_v55  ;;  %v1388_v3 = vmul.f32 0.1, %v3042_v47  ;;  %v1356_v4 = vadd.f32 %v2948_v42, %v1285_v48 }
 0x145   : > { %v2184_v5 = vpack.c.bf16 %v1451_v60, %v1450_v25  ;;  %v2264_v8 = vpack.c.bf16 %v1483_v61, %v1482_v33  ;;  %v2179_v9 = vpack.c.bf16 %v1449_v62, %v1448_v59  ;;  %v1454_v6 = vmax.f32 %v3036_v45, %v1390_v56  ;;  %v848_v10 = vpop.f32.mrf.mxu0  ;;  %v976_v11 = vpop.f32.mrf.mxu1 }
 0x146   : > { %v2259_v12 = vpack.c.bf16 %v1481_v2, %v1480_v1  ;;  %v1486_v13 = vmax.f32 %v3039_v46, %v1422_v57  ;;  %v1327_v14 = vadd.f32 %v2948_v42, %v1256_v52  ;;  %v1359_v7 = vadd.f32 %v2948_v42, %v1288_v58 }
 0x147   : > { %2320 = vst [vmem:[%s2984_s8 + $0x28] sm:$0xff] %v2184_v5   ;;  %2336 = vst [vmem:[%s2984_s8 + $0xa8] sm:$0xff] %v2264_v8   ;;  %v1254_v15 = vmul.f32 %v2943_v40, %v835_v53  ;;  %v1286_v16 = vmul.f32 %v2943_v40, %v963_v54  ;;  %v1259_v17 = vmul.f32 %v2421_v63, %v2943_v40  ;;  %v2422_v19 = vpop.f32.mrf.mxu0  ;;  %v2454_v20 = vpop.f32.mrf.mxu1  ;;  %v1420_v21 = vmul.f32 0.1, %v1356_v4 }
 0x148   : > { %2319 = vst [vmem:[%s2984_s8 + $0x20] sm:$0xff] %v2179_v9   ;;  %v1291_v18 = vmul.f32 %v2453_v0, %v2943_v40  ;;  %2335 = vst [vmem:[%s2984_s8 + $0xa0] sm:$0xff] %v2259_v12   ;;  %v1391_v22 = vmul.f32 0.1, %v1327_v14  ;;  %v1423_v23 = vmul.f32 0.1, %v1359_v7  ;;  %v1257_v24 = vmul.f32 %v2943_v40, %v848_v10 }
 0x149   : > { %v1325_v25 = vadd.f32 %v2948_v42, %v1254_v15  ;;  %v1357_v26 = vadd.f32 %v2948_v42, %v1286_v16  ;;  %v1330_v27 = vadd.f32 %v2948_v42, %v1259_v17  ;;  %v1289_v28 = vmul.f32 %v2943_v40, %v976_v11  ;;  %v851_v29 = vpop.f32.mrf.mxu0  ;;  %v979_v30 = vpop.f32.mrf.mxu1 }
 0x14a   : > { %v1455_v31 = vmax.f32 %v1327_v14, %v1391_v22  ;;  %v1487_v32 = vmax.f32 %v1359_v7, %v1423_v23  ;;  %v3071_v33 = vadd.f32 %v2948_v42, %v1291_v18  ;;  %v3074_v34 = vadd.f32 %v2948_v42, %v1257_v24 }
 0x14b   : > { %v1389_v35 = vmul.f32 0.1, %v1325_v25  ;;  %v1421_v36 = vmul.f32 0.1, %v1357_v26  ;;  %v1394_v37 = vmul.f32 0.1, %v1330_v27  ;;  %v1260_v38 = vmul.f32 %v2422_v19, %v2943_v40  ;;  %v2425_v39 = vpop.f32.mrf.mxu0  ;;  %v2457_v41 = vpop.f32.mrf.mxu1 }
 0x14c   : > { %v1452_v43 = vmax.f32 %v3042_v47, %v1388_v3  ;;  %v2194_v44 = vpack.c.bf16 %v1455_v31, %v1454_v6  ;;  %v2274_v45 = vpack.c.bf16 %v1487_v32, %v1486_v13  ;;  %v1484_v46 = vmax.f32 %v1356_v4, %v1420_v21 }
 0x14d   : > { %v1453_v48 = vmax.f32 %v1325_v25, %v1389_v35  ;;  %v1485_v49 = vmax.f32 %v1357_v26, %v1421_v36  ;;  %v1360_v50 = vadd.f32 %v2948_v42, %v1289_v28  ;;  %v864_v51 = vpop.f32.mrf.mxu0  ;;  %v992_v52 = vpop.f32.mrf.mxu1  ;;  %v1426_v53 = vmul.f32 0.1, %v3071_v33 }
 0x14e   : > { %2322 = vst [vmem:[%s2984_s8 + $0x38] sm:$0xff] %v2194_v44   ;;  %2338 = vst [vmem:[%s2984_s8 + $0xb8] sm:$0xff] %v2274_v45   ;;  %v1392_v54 = vmul.f32 0.1, %v3074_v34  ;;  %v1331_v55 = vadd.f32 %v2948_v42, %v1260_v38  ;;  %v1292_v47 = vmul.f32 %v2454_v20, %v2943_v40  ;;  %v1458_v58 = vmax.f32 %v1330_v27, %v1394_v37 }
 0x14f   : > { %v2189_v56 = vpack.c.bf16 %v1453_v48, %v1452_v43  ;;  %v2269_v57 = vpack.c.bf16 %v1485_v49, %v1484_v46  ;;  %v1258_v59 = vmul.f32 %v2943_v40, %v851_v29  ;;  %v2426_v60 = vpop.f32.mrf.mxu0  ;;  %v2458_v61 = vpop.f32.mrf.mxu1  ;;  %v1290_v0 = vmul.f32 %v2943_v40, %v979_v30 }
 0x150   : > { %v1395_v62 = vmul.f32 0.1, %v1331_v55  ;;  %v1363_v63 = vadd.f32 %v2948_v42, %v1292_v47  ;;  %v1263_v1 = vmul.f32 %v2425_v39, %v2943_v40  ;;  %v1295_v3 = vmul.f32 %v2457_v41, %v2943_v40 }
 0x151   : > { %2321 = vst [vmem:[%s2984_s8 + $0x30] sm:$0xff] %v2189_v56   ;;  %2337 = vst [vmem:[%s2984_s8 + $0xb0] sm:$0xff] %v2269_v57   ;;  %v1329_v2 = vadd.f32 %v2948_v42, %v1258_v59  ;;  %v1261_v4 = vmul.f32 %v2943_v40, %v864_v51  ;;  %v1293_v5 = vmul.f32 %v2943_v40, %v992_v52  ;;  %v867_v8 = vpop.f32.mrf.mxu0  ;;  %v995_v9 = vpop.f32.mrf.mxu1  ;;  %v1424_v6 = vmul.f32 0.1, %v1360_v50 }
 0x152   : > { %v1459_v10 = vmax.f32 %v1331_v55, %v1395_v62  ;;  %v1427_v11 = vmul.f32 0.1, %v1363_v63  ;;  %v1361_v12 = vadd.f32 %v2948_v42, %v1290_v0  ;;  %v1334_v14 = vadd.f32 %v2948_v42, %v1263_v1 }
 0x153   : > { %v1393_v13 = vmul.f32 0.1, %v1329_v2  ;;  %v3098_v7 = vadd.f32 %v2948_v42, %v1295_v3  ;;  %v3101_v15 = vadd.f32 %v2948_v42, %v1261_v4  ;;  %v2429_v16 = vpop.f32.mrf.mxu0  ;;  %v2461_v17 = vpop.f32.mrf.mxu1  ;;  %v1490_v18 = vmax.f32 %v3071_v33, %v1426_v53 }
 0x154   : > { %v2204_v19 = vpack.c.bf16 %v1459_v10, %v1458_v58  ;;  %v1491_v20 = vmax.f32 %v1363_v63, %v1427_v11  ;;  %v1425_v21 = vmul.f32 0.1, %v1361_v12  ;;  %v1456_v22 = vmax.f32 %v3074_v34, %v1392_v54 }
 0x155   : > { %v1457_v23 = vmax.f32 %v1329_v2, %v1393_v13  ;;  %v1364_v24 = vadd.f32 %v2948_v42, %v1293_v5  ;;  %v880_v25 = vpop.f32.mrf.mxu0  ;;  %v1008_v26 = vpop.f32.mrf.mxu1  ;;  %v1488_v27 = vmax.f32 %v1360_v50, %v1424_v6  ;;  %v1264_v30 = vmul.f32 %v2426_v60, %v2943_v40 }
 0x156   : > { %2324 = vst [vmem:[%s2984_s8 + $0x48] sm:$0xff] %v2204_v19   ;;  %v2284_v28 = vpack.c.bf16 %v1491_v20, %v1490_v18  ;;  %v1489_v29 = vmax.f32 %v1361_v12, %v1425_v21  ;;  %v1398_v32 = vmul.f32 0.1, %v1334_v14  ;;  %v1430_v33 = vmul.f32 0.1, %v3098_v7 }
 0x157   : > { %v2199_v31 = vpack.c.bf16 %v1457_v23, %v1456_v22  ;;  %v1396_v34 = vmul.f32 0.1, %v3101_v15  ;;  %v2430_v35 = vpop.f32.mrf.mxu0  ;;  %v2462_v36 = vpop.f32.mrf.mxu1  ;;  %v1335_v38 = vadd.f32 %v2948_v42, %v1264_v30  ;;  %v1296_v39 = vmul.f32 %v2458_v61, %v2943_v40 }
 0x158   : > { %2340 = vst [vmem:[%s2984_s8 + $0xc8] sm:$0xff] %v2284_v28   ;;  %v2279_v37 = vpack.c.bf16 %v1489_v29, %v1488_v27  ;;  %v1262_v41 = vmul.f32 %v2943_v40, %v867_v8  ;;  %v1428_v43 = vmul.f32 0.1, %v1364_v24  ;;  %v1294_v44 = vmul.f32 %v2943_v40, %v995_v9 }
 0x159   : > { %2323 = vst [vmem:[%s2984_s8 + $0x40] sm:$0xff] %v2199_v31   ;;  %v1267_v45 = vmul.f32 %v2429_v16, %v2943_v40  ;;  %v1299_v46 = vmul.f32 %v2461_v17, %v2943_v40  ;;  %v883_v48 = vpop.f32.mrf.mxu0  ;;  %v1011_v49 = vpop.f32.mrf.mxu1  ;;  %v1399_v50 = vmul.f32 0.1, %v1335_v38  ;;  %v1367_v51 = vadd.f32 %v2948_v42, %v1296_v39 }
 0x15a   : > { %2339 = vst [vmem:[%s2984_s8 + $0xc0] sm:$0xff] %v2279_v37   ;;  %v1333_v52 = vadd.f32 %v2948_v42, %v1262_v41  ;;  %v1265_v53 = vmul.f32 %v2943_v40, %v880_v25  ;;  %v1462_v54 = vmax.f32 %v1334_v14, %v1398_v32  ;;  %v1494_v55 = vmax.f32 %v3098_v7, %v1430_v33 }
 0x15b   : > { %v1365_v47 = vadd.f32 %v2948_v42, %v1294_v44  ;;  %v1338_v56 = vadd.f32 %v2948_v42, %v1267_v45  ;;  %v2433_v57 = vpop.f32.mrf.mxu0  ;;  %v1463_v58 = vmax.f32 %v1335_v38, %v1399_v50  ;;  %v1431_v59 = vmul.f32 0.1, %v1367_v51  ;;  %v2465_v62 = vpop.f32.mrf.mxu1 }
 0x15c   : > { %v1397_v60 = vmul.f32 0.1, %v1333_v52  ;;  %v1297_v61 = vmul.f32 %v2943_v40, %v1008_v26  ;;  %v1460_v63 = vmax.f32 %v3101_v15, %v1396_v34  ;;  %v1370_v1 = vadd.f32 %v2948_v42, %v1299_v46 }
 0x15d   : > { %v1429_v0 = vmul.f32 0.1, %v1365_v47  ;;  %v1268_v2 = vmul.f32 %v2430_v35, %v2943_v40  ;;  %v2214_v3 = vpack.c.bf16 %v1463_v58, %v1462_v54  ;;  %v1495_v4 = vmax.f32 %v1367_v51, %v1431_v59  ;;  %v896_v11 = vpop.f32.mrf.mxu0  ;;  %v1024_v15 = vpop.f32.mrf.mxu1 }
 0x15e   : > { %v1461_v5 = vmax.f32 %v1333_v52, %v1397_v60  ;;  %v1336_v8 = vadd.f32 %v2948_v42, %v1265_v53  ;;  %v1492_v9 = vmax.f32 %v1364_v24, %v1428_v43  ;;  %v1402_v10 = vmul.f32 0.1, %v1338_v56 }
 0x15f   : > { %v1493_v6 = vmax.f32 %v1365_v47, %v1429_v0  ;;  %2326 = vst [vmem:[%s2984_s8 + $0x58] sm:$0xff] %v2214_v3   ;;  %v2294_v12 = vpack.c.bf16 %v1495_v4, %v1494_v55  ;;  %v1368_v14 = vadd.f32 %v2948_v42, %v1297_v61  ;;  %v1339_v7 = vadd.f32 %v2948_v42, %v1268_v2  ;;  %v2434_v28 = vpop.f32.mrf.mxu0  ;;  %v2466_v33 = vpop.f32.mrf.mxu1 }
 0x160   : > { %v2209_v13 = vpack.c.bf16 %v1461_v5, %v1460_v63  ;;  %v1434_v17 = vmul.f32 0.1, %v1370_v1  ;;  %v1300_v18 = vmul.f32 %v2462_v36, %v2943_v40  ;;  %v1266_v19 = vmul.f32 %v2943_v40, %v883_v48 }
 0x161   : > { %v2289_v16 = vpack.c.bf16 %v1493_v6, %v1492_v9  ;;  %2342 = vst [vmem:[%s2984_s8 + $0xd8] sm:$0xff] %v2294_v12   ;;  %v1400_v20 = vmul.f32 0.1, %v1336_v8  ;;  %v1403_v21 = vmul.f32 0.1, %v1339_v7  ;;  %v1298_v22 = vmul.f32 %v2943_v40, %v1011_v49  ;;  %v899_v48 = vpop.f32.mrf.mxu0  ;;  %v1027_v53 = vpop.f32.mrf.mxu1 }
 0x162   : > { %2325 = vst [vmem:[%s2984_s8 + $0x50] sm:$0xff] %v2209_v13   ;;  %v1271_v23 = vmul.f32 %v2433_v57, %v2943_v40  ;;  %v1466_v24 = vmax.f32 %v1338_v56, %v1402_v10  ;;  %v1371_v25 = vadd.f32 %v2948_v42, %v1300_v18  ;;  %v1337_v26 = vadd.f32 %v2948_v42, %v1266_v19 }
 0x163   : > { %2341 = vst [vmem:[%s2984_s8 + $0xd0] sm:$0xff] %v2289_v16   ;;  %v1303_v27 = vmul.f32 %v2465_v62, %v2943_v40  ;;  %v1432_v29 = vmul.f32 0.1, %v1368_v14  ;;  %v1467_v30 = vmax.f32 %v1339_v7, %v1403_v21  ;;  %v1369_v31 = vadd.f32 %v2948_v42, %v1298_v22 }
 0x164   : > { %v1269_v32 = vmul.f32 %v2943_v40, %v896_v11  ;;  %v1435_v34 = vmul.f32 0.1, %v1371_v25  ;;  %v1401_v35 = vmul.f32 0.1, %v1337_v26  ;;  %v1342_v36 = vadd.f32 %v2948_v42, %v1271_v23 }
 0x165   : > { %v1301_v37 = vmul.f32 %v2943_v40, %v1024_v15  ;;  %v1498_v38 = vmax.f32 %v1370_v1, %v1434_v17  ;;  %v2224_v39 = vpack.c.bf16 %v1467_v30, %v1466_v24  ;;  %v1433_v41 = vmul.f32 0.1, %v1369_v31 }
 0x166   : > { %v1464_v43 = vmax.f32 %v1336_v8, %v1400_v20  ;;  %v1499_v44 = vmax.f32 %v1371_v25, %v1435_v34  ;;  %v1465_v45 = vmax.f32 %v1337_v26, %v1401_v35  ;;  %v1374_v46 = vadd.f32 %v2948_v42, %v1303_v27 }
 0x167   : > { %v1496_v49 = vmax.f32 %v1368_v14, %v1432_v29  ;;  %2328 = vst [vmem:[%s2984_s8 + $0x68] sm:$0xff] %v2224_v39   ;;  %v1497_v50 = vmax.f32 %v1369_v31, %v1433_v41  ;;  %v1340_v51 = vadd.f32 %v2948_v42, %v1269_v32  ;;  %v1272_v52 = vmul.f32 %v2434_v28, %v2943_v40 }
 0x168   : > { %v2304_v54 = vpack.c.bf16 %v1499_v44, %v1498_v38  ;;  %v2219_v55 = vpack.c.bf16 %v1465_v45, %v1464_v43  ;;  %v1406_v47 = vmul.f32 0.1, %v1342_v36  ;;  %v1372_v56 = vadd.f32 %v2948_v42, %v1301_v37 }
 0x169   : > { %v2299_v57 = vpack.c.bf16 %v1497_v50, %v1496_v49  ;;  %v1343_v58 = vadd.f32 %v2948_v42, %v1272_v52  ;;  %v1304_v59 = vmul.f32 %v2466_v33, %v2943_v40  ;;  %v1270_v60 = vmul.f32 %v2943_v40, %v899_v48 }
 0x16a   : > { %2344 = vst [vmem:[%s2984_s8 + $0xe8] sm:$0xff] %v2304_v54   ;;  %2327 = vst [vmem:[%s2984_s8 + $0x60] sm:$0xff] %v2219_v55   ;;  %v1438_v61 = vmul.f32 0.1, %v1374_v46  ;;  %v1302_v62 = vmul.f32 %v2943_v40, %v1027_v53  ;;  %v1404_v63 = vmul.f32 0.1, %v1340_v51  ;;  %v1470_v5 = vmax.f32 %v1342_v36, %v1406_v47 }
 0x16b   : > { %2343 = vst [vmem:[%s2984_s8 + $0xe0] sm:$0xff] %v2299_v57   ;;  %v1407_v0 = vmul.f32 0.1, %v1343_v58  ;;  %v1375_v1 = vadd.f32 %v2948_v42, %v1304_v59  ;;  %v1341_v2 = vadd.f32 %v2948_v42, %v1270_v60  ;;  %v1436_v3 = vmul.f32 0.1, %v1372_v56 }
 0x16c   : > { %v1373_v4 = vadd.f32 %v2948_v42, %v1302_v62  ;;  %v1502_v10 = vmax.f32 %v1374_v46, %v1438_v61  ;;  %v1468_v40 = vmax.f32 %v1340_v51, %v1404_v63 }
 0x16d   : > { %v1471_v8 = vmax.f32 %v1343_v58, %v1407_v0  ;;  %v1439_v9 = vmul.f32 0.1, %v1375_v1  ;;  %v1405_v6 = vmul.f32 0.1, %v1341_v2  ;;  %v1500_v7 = vmax.f32 %v1372_v56, %v1436_v3 }
 0x16e   : > { %v1437_v11 = vmul.f32 0.1, %v1373_v4 }
 0x16f   : > { %v2234_v12 = vpack.c.bf16 %v1471_v8, %v1470_v5  ;;  %v1503_v13 = vmax.f32 %v1375_v1, %v1439_v9  ;;  %v1469_v14 = vmax.f32 %v1341_v2, %v1405_v6 }
 0x170   : > { %v1501_v15 = vmax.f32 %v1373_v4, %v1437_v11 }
 0x171   : > { %2330 = vst [vmem:[%s2984_s8 + $0x78] sm:$0xff] %v2234_v12   ;;  %v2314_v42 = vpack.c.bf16 %v1503_v13, %v1502_v10  ;;  %v2229_v16 = vpack.c.bf16 %v1469_v14, %v1468_v40 }
 0x172   : > { %v2309_v17 = vpack.c.bf16 %v1501_v15, %v1500_v7 }
 0x173   : > { %2346 = vst [vmem:[%s2984_s8 + $0xf8] sm:$0xff] %v2314_v42   ;;  %2329 = vst [vmem:[%s2984_s8 + $0x70] sm:$0xff] %v2229_v16  }
 0x174   : > { %2345 = vst [vmem:[%s2984_s8 + $0xf0] sm:$0xff] %v2309_v17  }
 0x175   : > { %2667 = shalt.err (!%p2664_p3)
}
 0x176   : > { %s2668_s30 = scalar_lea.hbm %s3168_s11, 4096  ;;  %s2672_s25 = scalar_lea.hbm %s3224_s4, 16384 }
 0x177   : > { %p2669_p5 = scmp.ne.s32.totalorder %s3168_s11, %s2668_s30  ;;  %p2673_p9 = scmp.lt.s32.totalorder %s3168_s11, %s3224_s4 }
 0x178   : > { %p2674_p11 = scmp.lt.s32.totalorder %s2672_s25, %s2668_s30 }
 0x179   : > { %p2670_p7 = pnand %p2669_p5, %p3241_p4 }
 0x17a   : > { %p2675_p10 = por %p2674_p11, %p2673_p9 }
 0x17b   : > { %p2671_p6 = pneg %p2670_p7 }
 0x17d   : > { %p2676_p1 = pnand %p2675_p10, %p2671_p6 }
 0x17f   : > { %2679 = shalt.err (!%p2676_p1)
}
 0x180   : > { %s2745_s8 = smov 64   ;;  %s2746_s9 = smov 4  }
 0x181   : > { %2489 = dma.vmem_to_hbm [thread:$0]  (%p3241_p4), %s3170_s10, 4096, %s3168_s11, %s1825_s18, %s2745_s8, %s2745_s8, %s2746_s9  }
 0x182 PF: > { %p2506_p8 = scmp.ge.s32.totalorder %s2738_s20, 2  ;;  %s1854_s24 = sand.u32 1, %s2718_s15  }
 0x183   : > { %p3242_p12 = scmp.ne.s32.totalorder %s3232_s26, 0  ;;  %s1855_s14 = scalar_lea.sflag [#allocation5], %s1854_s24 }
 0x185   : > { %p2500_p13 = pnand %p2506_p8, %p3242_p12 }
 0x187   : > { %p2501_p0 = pneg %p2500_p13 }
 0x189   : > { %2713 = dma.done.wait (%p2501_p0), %s1855_s14, 4096  }
 0x18a   : > { %2715 = vsyncadd (%p2501_p0), %s1855_s14, 4294963200  ;;  %s21_s20 = sadd.s32 1, %s2738_s20   ;;  %s3243_s15 = smov %s2722_s16 }
 0x18b   : > { %p18_p2 = scmp.ge.s32.totalorder %s21_s20, 6   ;;  %s3244_s16 = smov %s2726_s17 }
 0x18c   : > { %s3245_s17 = smov %s2870_s28  ;;  %s3246_s18 = smov %s2734_s19 }
 0x18d   : > { %s3247_s19 = smov %s3249_s5  ;;  %20 = sbr.rel (!%p18_p2) target bundleno = 9 (0x9), region = 100 }
 0x192   :  { %1860 = vsyncpa [#allocation4], 1 }
 0x193   :  { %1862 = vsyncpa [#allocation4 + $0x1], 1 }
 0x194   :  { %1863 = vsyncpa [#allocation7], 1 }
 0x195   :  { %1864 = vsyncpa [#allocation5], 1 }
 0x196   :  { %1866 = vsyncpa [#allocation5 + $0x1], 1 }

</bundles_post_ra>
